<compile_context>
chip_gen: v7x
topology: tpu7x:2x2x1
jax: 0.10.0
libtpu: 0.0.40
codegen_flags: <defaults>
</compile_context>

<pallas_src>
import jax
import jax.numpy as jnp
from jax.experimental import pallas as pl
from jax.experimental.pallas import tpu as pltpu

_LANE_W = 1024            # one f32 vreg slab: 8 sublanes x 128 lanes
_TILE_R = 256             # rows per grid step -> 256*1024*4 B = 1 MiB block
_PALLAS_MIN_ELEMS = 2048  # below this, plain JAX (overhead-dominated op)


def _drift_kernel(w_ref, b_ref, x_ref, o_ref):
    # w_ref: SMEM (1, 1) scalar weight; b_ref: SMEM (1,) scalar bias
    # x_ref / o_ref: (tile_r, 1024) lane-dense VMEM tiles
    w = w_ref[0, 0]
    b = b_ref[0]
    y = x_ref[...] * w + b              # Linear(1, 1): x @ W^T + b
    o_ref[...] = jnp.maximum(y, 0.0)    # ReLU


def _drift_pallas_flat(x_flat, weight, bias):
    """Run the lane-dense Pallas kernel on a flattened 1-D input."""
    n = x_flat.shape[0]
    rows = pl.cdiv(n, _LANE_W)
    if rows >= _TILE_R:
        tile_r = _TILE_R
        rows = pl.cdiv(rows, _TILE_R) * _TILE_R   # pad rows to full tiles
    else:
        tile_r = rows                             # single full-array block
    padded = rows * _LANE_W

    # Zero-pad to a whole number of (tile_r, 1024) blocks; padded tail is
    # computed then sliced off (ReLU on pad values never leaks into output).
    x2d = jnp.pad(x_flat, (0, padded - n)).reshape(rows, _LANE_W)

    out2d = pl.pallas_call(
        _drift_kernel,
        out_shape=jax.ShapeDtypeStruct((rows, _LANE_W), x_flat.dtype),
        grid=(rows // tile_r,),
        in_specs=[
            pl.BlockSpec(memory_space=pltpu.SMEM),          # weight (1, 1)
            pl.BlockSpec(memory_space=pltpu.SMEM),          # bias   (1,)
            pl.BlockSpec((tile_r, _LANE_W), lambda i: (i, 0)),
        ],
        out_specs=pl.BlockSpec((tile_r, _LANE_W), lambda i: (i, 0)),
        compiler_params=pltpu.CompilerParams(
            dimension_semantics=("parallel",),   # megacore split on v7x
        ),
    )(weight, bias, x2d)

    return out2d.reshape(-1)[:n]


def drift_forward(t, x, weight, bias):
    """Pallas equivalent of Drift.forward(t, x) = relu(fc(x)).

    t is accepted for signature parity with the PyTorch module but unused.
    x:      (..., 1) float32   (same layout as the nn.Linear input)
    weight: (1, 1)   float32   (nn.Linear.weight)
    bias:   (1,)     float32   (nn.Linear.bias)
    """
    del t  # unused, matches PyTorch semantics
    w = weight.astype(x.dtype)
    b = bias.astype(x.dtype)
    orig_shape = x.shape
    x_flat = x.reshape(-1)

    if x_flat.shape[0] < _PALLAS_MIN_ELEMS:
        # Launch + DMA overhead exceeds the 2-FLOP/element compute; let XLA
        # fuse the affine+ReLU into neighboring ops instead.
        y = jnp.maximum(x_flat * w[0, 0] + b[0], 0.0)
    else:
        y = _drift_pallas_flat(x_flat, w, b)

    return y.reshape(orig_shape)


if __name__ == "__main__":
    key = jax.random.PRNGKey(0)
    kx1, kx2, kw, kb = jax.random.split(key, 4)

    # nn.Linear(1, 1) init: uniform in (-1/sqrt(fan_in), 1/sqrt(fan_in)) = (-1, 1)
    weight = jax.random.uniform(kw, (1, 1), minval=-1.0, maxval=1.0,
                                dtype=jnp.float32)
    bias = jax.random.uniform(kb, (1,), minval=-1.0, maxval=1.0,
                              dtype=jnp.float32)
    t = jnp.float32(0.5)  # unused by the forward, present for parity

    def ref_fn(x):
        return jnp.maximum(x @ weight.T + bias, 0.0)

    # Small batch: wrapper takes the plain-JAX fast path (overhead-dominated).
    x_small = jax.random.normal(kx1, (8, 1), dtype=jnp.float32)
    out_small = jax.block_until_ready(drift_forward(t, x_small, weight, bias))
    assert out_small.shape == x_small.shape
    assert jnp.allclose(out_small, ref_fn(x_small), atol=1e-6), "small mismatch"

    # Larger batch (not a multiple of the 1024-wide slab): exercises the
    # lane-dense Pallas kernel plus the pad / slice-back plumbing.
    x_big = jax.random.normal(kx2, (4100, 1), dtype=jnp.float32)
    out_big = jax.block_until_ready(drift_forward(t, x_big, weight, bias))
    assert out_big.shape == x_big.shape
    assert jnp.allclose(out_big, ref_fn(x_big), atol=1e-6), "big mismatch"

    print("KERNEL_OK")
</pallas_src>

<mosaic_0001>
module attributes {stable_mosaic.version = 11 : i64} {
  func.func @_drift_kernel(%arg0: i32, %arg1: memref<1x1xf32, #tpu.memory_space<smem>>, %arg2: memref<1xf32, #tpu.memory_space<smem>>, %arg3: memref<5x1024xf32, #tpu.memory_space<vmem>>, %arg4: memref<5x1024xf32, #tpu.memory_space<vmem>>) attributes {dimension_semantics = [#tpu.dimension_semantics<parallel>], iteration_bounds = array<i64: 1>, scalar_prefetch = 0 : i64, scratch_operands = 0 : i64, tpu.core_type = #tpu.core_type<tc>, window_params = [{transform_indices = @transform_0, window_bounds = array<i64: 1, 1>}, {transform_indices = @transform_1, window_bounds = array<i64: 1>}, {transform_indices = @transform_2, window_bounds = array<i64: 5, 1024>}, {transform_indices = @transform_3, window_bounds = array<i64: 5, 1024>}]} {
    %c0 = arith.constant 0 : index
    %c0_0 = arith.constant 0 : index
    %0 = memref.load %arg1[%c0, %c0_0] : memref<1x1xf32, #tpu.memory_space<smem>>
    %c0_1 = arith.constant 0 : index
    %1 = memref.load %arg2[%c0_1] : memref<1xf32, #tpu.memory_space<smem>>
    %c0_2 = arith.constant 0 : index
    %c0_3 = arith.constant 0 : index
    %2 = vector.load %arg3[%c0_2, %c0_3] : memref<5x1024xf32, #tpu.memory_space<vmem>>, vector<5x1024xf32>
    %3 = vector.broadcast %0 : f32 to vector<5x1024xf32>
    %4 = arith.mulf %2, %3 : vector<5x1024xf32>
    %5 = vector.broadcast %1 : f32 to vector<5x1024xf32>
    %6 = arith.addf %4, %5 : vector<5x1024xf32>
    %cst = arith.constant 0.000000e+00 : f32
    %7 = vector.broadcast %cst : f32 to vector<5x1024xf32>
    %8 = arith.maximumf %6, %7 : vector<5x1024xf32>
    %c0_4 = arith.constant 0 : index
    %c0_5 = arith.constant 0 : index
    %9 = vector.load %arg4[%c0_4, %c0_5] : memref<5x1024xf32, #tpu.memory_space<vmem>>, vector<5x1024xf32>
    tpu.vector_store %arg4[%c0_4, %c0_5], %8 {strides = array<i32>} : memref<5x1024xf32, #tpu.memory_space<vmem>>, vector<5x1024xf32>,
    return
  }
  func.func @transform_0(%arg0: i32) -> (i32, i32) {
    %c0_i32 = arith.constant 0 : i32
    %c0_i32_0 = arith.constant 0 : i32
    %c0_i32_1 = arith.constant 0 : i32
    return %c0_i32, %c0_i32_0 : i32, i32
  }
  func.func @transform_1(%arg0: i32) -> i32 {
    %c0_i32 = arith.constant 0 : i32
    %c0_i32_0 = arith.constant 0 : i32
    return %c0_i32 : i32
  }
  func.func @transform_2(%arg0: i32) -> (i32, i32) {
    %c0_i32 = arith.constant 0 : i32
    %c0_i32_0 = arith.constant 0 : i32
    return %arg0, %c0_i32 : i32, i32
  }
  func.func @transform_3(%arg0: i32) -> (i32, i32) {
    %c0_i32 = arith.constant 0 : i32
    %c0_i32_0 = arith.constant 0 : i32
    return %arg0, %c0_i32 : i32, i32
  }
}

</mosaic_0001>

<bundles_post_ra>
// kernel: tpu_custom_call.1
= control target key start
LH: loop header
LB: loop body
LE: loop exit
PB: predicated region body
PF: predicated region fallthrough
CT: control target
= control target key end

     0   :  { %10 = vsyncpa [#allocation5], 0  ;;  %s190_s0 = inlined_call_operand.<no memory space> [shape: f32[1,1], index: 0, kind: input, shape index: {}]   ;;  %s191_s1 = inlined_call_operand.<no memory space> [shape: f32[1], index: 1, kind: input, shape index: {}]   ;;  %s192_s2 = inlined_call_operand.hbm [shape: f32[5,1024], index: 2, kind: input, shape index: {}]   ;;  %s193_s3 = inlined_call_operand.hbm [shape: f32[5,1024], index: 3, kind: output, shape index: {}]  }
   0x1   :  { %11 = vsyncpa [#allocation6], 0  ;;  %s138_s12 = smov [#allocation4]   ;;  %s90_s16 = scalar_lea.hbm %s192_s2, 1024 }
   0x2   :  { %s22_s13 = sshll.u32 %s138_s12, 4  ;;  %p91_p0 = scmp.ne.s32.totalorder %s192_s2, %s90_s16  ;;  %s23_s13 = int_to_ptr.vmem [resolvable:$true] %s22_s13 }
   0x3   :  { %p94_p1 = scmp.lt.u32.totalorder %s90_s16, %s192_s2 }
   0x5   :  { %p96_p2 = pnand %p94_p1, %p91_p0 }
   0x7   :  { %99 = shalt.err (!%p96_p2)
}
   0x8   :  { %s100_s21 = scalar_lea.vmem %s23_s13, 1024  ;;  %p105_p4 = scmp.lt.s32.totalorder %s23_s13, %s23_s13 }
   0x9   :  { %p101_p3 = scmp.ne.s32.totalorder %s23_s13, %s100_s21  ;;  %p106_p5 = scmp.lt.s32.totalorder %s100_s21, %s100_s21 }
   0xb   :  { %p107_p6 = por %p106_p5, %p105_p4 }
   0xd   :  { %p108_p7 = pnand %p107_p6, %p101_p3 }
   0xf   :  { %111 = shalt.err (!%p108_p7)
}
  0x10   :  { %25 = dma.hbm_to_vmem [thread:$0]  %s192_s2, 1024, %s23_s13, [#allocation5]  }
  0x11   :  { %134 = dma.done.wait [#allocation5], 1024  }
  0x12   :  { %135 = vsyncadd [#allocation5], 4294966272  ;;  %v39_v0 = vstv %s190_s0  ;;  %v31_v1 = vld [vmem:[#allocation4] sm:$0x1f]  ;;  %v48_v2 = vstv %s191_s1  ;;  %v32_v3 = vld [vmem:[#allocation4 + $0x8] sm:$0x1f] }
  0x13   :  { %v33_v4 = vld [vmem:[#allocation4 + $0x10] sm:$0x1f]  ;;  %v40_v5 = vmul.f32 %v39_v0, %v31_v1  ;;  %v41_v6 = vmul.f32 %v39_v0, %v32_v3  ;;  %v34_v8 = vld [vmem:[#allocation4 + $0x18] sm:$0x1f]  ;;  %v35_v9 = vld [vmem:[#allocation4 + $0x20] sm:$0x1f] }
  0x14   :  { %v42_v7 = vmul.f32 %v39_v0, %v33_v4  ;;  %v36_v10 = vld [vmem:[#allocation4 + $0x28] sm:$0x1f]  ;;  %v43_v11 = vmul.f32 %v39_v0, %v34_v8  ;;  %v44_v12 = vmul.f32 %v39_v0, %v35_v9  ;;  %v37_v14 = vld [vmem:[#allocation4 + $0x30] sm:$0x1f]  ;;  %v38_v15 = vld [vmem:[#allocation4 + $0x38] sm:$0x1f] }
  0x15   :  { %v45_v13 = vmul.f32 %v39_v0, %v36_v10  ;;  %v49_v16 = vadd.f32 %v48_v2, %v40_v5  ;;  %v50_v17 = vadd.f32 %v48_v2, %v41_v6  ;;  %v46_v19 = vmul.f32 %v39_v0, %v37_v14  ;;  %s139_s0 = smov [#allocation7]  }
  0x16   :  { %v51_v18 = vadd.f32 %v48_v2, %v42_v7  ;;  %v52_v20 = vadd.f32 %v48_v2, %v43_v11  ;;  %v53_v21 = vadd.f32 %v48_v2, %v44_v12  ;;  %v47_v23 = vmul.f32 %v39_v0, %v38_v15  ;;  %s79_s1 = sshll.u32 %s139_s0, 4  ;;  %s80_s1 = int_to_ptr.vmem [resolvable:$true] %s79_s1 }
  0x17   :  { %v54_v22 = vadd.f32 %v48_v2, %v45_v13  ;;  %v57_v24 = vmax.f32 %v49_v16, 0.0  ;;  %v58_v25 = vmax.f32 %v50_v17, 0.0  ;;  %v55_v27 = vadd.f32 %v48_v2, %v46_v19  ;;  %s112_s2 = scalar_lea.vmem %s80_s1, 1024  ;;  %p117_p9 = scmp.lt.s32.totalorder %s80_s1, %s80_s1 }
  0x18   :  { %v59_v26 = vmax.f32 %v51_v18, 0.0  ;;  %v60_v28 = vmax.f32 %v52_v20, 0.0  ;;  %v61_v29 = vmax.f32 %v53_v21, 0.0  ;;  %v56_v31 = vadd.f32 %v48_v2, %v47_v23  ;;  %p113_p8 = scmp.ne.s32.totalorder %s80_s1, %s112_s2  ;;  %p118_p10 = scmp.lt.s32.totalorder %s112_s2, %s112_s2 }
  0x19   :  { %v62_v30 = vmax.f32 %v54_v22, 0.0  ;;  %65 = vst [vmem:[#allocation7] sm:$0x1f] %v57_v24  ;;  %66 = vst [vmem:[#allocation7 + $0x8] sm:$0x1f] %v58_v25  ;;  %v63_v32 = vmax.f32 %v55_v27, 0.0 }
  0x1a   :  { %67 = vst [vmem:[#allocation7 + $0x10] sm:$0x1f] %v59_v26  ;;  %68 = vst [vmem:[#allocation7 + $0x18] sm:$0x1f] %v60_v28  ;;  %v64_v33 = vmax.f32 %v56_v31, 0.0  ;;  %p119_p11 = por %p118_p10, %p117_p9 }
  0x1b   :  { %69 = vst [vmem:[#allocation7 + $0x20] sm:$0x1f] %v61_v29  ;;  %70 = vst [vmem:[#allocation7 + $0x28] sm:$0x1f] %v62_v30 }
  0x1c   :  { %71 = vst [vmem:[#allocation7 + $0x30] sm:$0x1f] %v63_v32  ;;  %72 = vst [vmem:[#allocation7 + $0x38] sm:$0x1f] %v64_v33  ;;  %p120_p12 = pnand %p119_p11, %p113_p8 }
  0x1e   :  { %123 = shalt.err (!%p120_p12)
}
  0x1f   :  { %s124_s30 = scalar_lea.hbm %s193_s3, 1024 }
  0x20   :  { %p125_p13 = scmp.ne.s32.totalorder %s193_s3, %s124_s30  ;;  %p128_p0 = scmp.lt.u32.totalorder %s124_s30, %s193_s3 }
  0x22   :  { %p130_p1 = pnand %p128_p0, %p125_p13 }
  0x24   :  { %133 = shalt.err (!%p130_p1)
}
  0x25   :  { %82 = dma.vmem_to_hbm [thread:$0]  %s80_s1, 1024, %s193_s3, [#allocation6]  }
  0x26   :  { %136 = dma.done.wait [#allocation6], 1024  }
  0x27   :  { %137 = vsyncadd [#allocation6], 4294966272 }
  0x28   :  { %86 = vsyncpa [#allocation5], 1 }
  0x29   :  { %87 = vsyncpa [#allocation6], 1 }

</bundles_post_ra>
